<compile_context>
chip_gen: v7x
topology: tpu7x:2x2x1
jax: 0.10.0
libtpu: 0.0.40
codegen_flags: <defaults>
</compile_context>

<pallas_src>
import jax
import jax.numpy as jnp
from jax.experimental import pallas as pl
from jax.experimental.pallas import tpu as pltpu


# ----------------------------------------------------------------------------- hardware queries
def _tpu_vmem_bytes():
    try:
        return int(pltpu.get_tpu_info().vmem_capacity_bytes)
    except Exception:
        return 64 << 20          # conservative (v7x-sized) fallback


def _tpu_num_tensorcores():
    """TensorCores addressable by one pallas_call (1 on v5e/v6e, 2 on v7x)."""
    try:
        info = pltpu.get_tpu_info()
        for name in ("num_cores", "core_count", "num_tensorcores",
                     "tensorcore_count", "cores_per_chip", "num_cores_per_chip"):
            v = getattr(info, name, None)
            if isinstance(v, int) and v > 0:
                return v
    except Exception:
        pass
    return 1


# ----------------------------------------------------------------------------- kernel
def _make_loss_kernel(*, has_snn, cnn_mode, tile_m, m_rows, acc_rows,
                      tiles_per_chunk, n_inner, needs_mask, grid_is_2d,
                      total_tiles):
    """Kernel specialized on which loss terms are present.

    cnn_mode: None (no cnn term), "2d" (4-D cnn vs mean-over-T targets) or
              "5d" (cnn already target-shaped).
    """
    has_cnn = cnn_mode is not None
    reduce_acc = (acc_rows != tile_m)
    groups = (tile_m // acc_rows) if reduce_acc else 1

    def _fold(sq):
        # Sublane-aligned fold of a (tile_m, L) tile of squared errors into an
        # (acc_rows, L) vreg-row accumulator shape: pure vreg adds, no XLU work.
        if reduce_acc:
            return sq.reshape(groups, acc_rows, sq.shape[-1]).sum(axis=0)
        return sq

    def kernel(*refs):
        it = iter(refs)
        # --- inputs ---
        out_ref = next(it)
        snn_ref = next(it) if has_snn else None
        tgt_ref = next(it)
        cnn_ref = next(it) if has_cnn else None
        pool_ref = next(it) if cnn_mode == "2d" else None
        # --- outputs (per-chunk partial sums) ---
        main_o = next(it)
        snn_o = next(it) if has_snn else None
        cnn_o = next(it) if has_cnn else None
        # --- VMEM scratch accumulators (vreg-row sized) ---
        acc_main = next(it)
        acc_snn = next(it) if has_snn else None
        acc_cnn = next(it) if has_cnn else None

        if grid_is_2d:
            c = pl.program_id(0)      # chunk axis (one per TensorCore on v7x)
            i = pl.program_id(1)      # sequential tile axis within the chunk
        else:
            i = pl.program_id(0)

        @pl.when(i == 0)
        def _init():
            acc_main[...] = jnp.zeros_like(acc_main)
            if has_snn:
                acc_snn[...] = jnp.zeros_like(acc_snn)
            if has_cnn:
                acc_cnn[...] = jnp.zeros_like(acc_cnn)

        tgt = tgt_ref[...].astype(jnp.float32)                       # (tile_m, W*T)
        d_main = out_ref[...].astype(jnp.float32) - tgt
        sq_main = d_main * d_main
        sq_snn = None
        sq_cnn = None
        if has_snn:
            d_snn = snn_ref[...].astype(jnp.float32) - tgt
            sq_snn = d_snn * d_snn
        if cnn_mode == "2d":
            # targets.mean(dim=-1) as a pooling matmul on the (idle) MXU:
            # pool[w*T + t, w] = 1/T, so (tile_m, W*T) @ (W*T, W) -> (tile_m, W).
            tgt_2d = jnp.dot(tgt, pool_ref[...], preferred_element_type=jnp.float32)
            d_cnn = cnn_ref[...].astype(jnp.float32) - tgt_2d
            sq_cnn = d_cnn * d_cnn
        elif cnn_mode == "5d":
            d_cnn = cnn_ref[...].astype(jnp.float32) - tgt
            sq_cnn = d_cnn * d_cnn

        def _accumulate(m, s, cn):
            acc_main[...] += _fold(m)
            if has_snn:
                acc_snn[...] += _fold(s)
            if has_cnn:
                acc_cnn[...] += _fold(cn)

        if needs_mask:
            # Only the last real tile (and any clamped over-provisioned slot) can
            # hold rows >= M; every full tile takes the unmasked fast path.
            if grid_is_2d:
                tile_idx = c * tiles_per_chunk + i
            else:
                tile_idx = i
            is_tail = tile_idx >= total_tiles - 1

            @pl.when(jnp.logical_not(is_tail))
            def _full():
                _accumulate(sq_main, sq_snn, sq_cnn)

            @pl.when(is_tail)
            def _tail():
                rows = tile_idx * tile_m + jax.lax.broadcasted_iota(
                    jnp.int32, (tile_m, 1), 0)
                valid = rows < m_rows                                # (tile_m, 1)
                # select (NOT multiply): OOB padding rows may hold Inf/NaN garbage.
                m = jnp.where(valid, sq_main, 0.0)
                s = jnp.where(valid, sq_snn, 0.0) if has_snn else None
                cn = jnp.where(valid, sq_cnn, 0.0) if has_cnn else None
                _accumulate(m, s, cn)
        else:
            _accumulate(sq_main, sq_snn, sq_cnn)

        @pl.when(i == n_inner - 1)
        def _flush():
            main_o[...] = jnp.zeros_like(main_o) + jnp.sum(acc_main[...])
            if has_snn:
                snn_o[...] = jnp.zeros_like(snn_o) + jnp.sum(acc_snn[...])
            if has_cnn:
                cnn_o[...] = jnp.zeros_like(cnn_o) + jnp.sum(acc_cnn[...])

    return kernel


# ----------------------------------------------------------------------------- wrapper
def robust_dual_channel_loss(outputs, targets, *, tile_m=None, n_chunks=None):
    """JAX/Pallas equivalent of RobustDualChannelLoss.forward.

    outputs: dict with 'output' (B,C,H,W,T); optionally 'snn_output' (B,C,H,W,T)
             and 'cnn_output' ((B,C,H,W) or (B,C,H,W,T)).  targets: (B,C,H,W,T).
    tile_m:  optional tile override along the flattened M=B*C*H axis (auto if None).
    n_chunks: leading chunk axis size; defaults to the detected TensorCore count
              (1 on v5e/v6e -> plain 1-D grid, 2 on v7x -> CORE_PARALLEL chunks).
    """
    B, C, H, W, T = targets.shape
    M = B * C * H
    WT = W * T

    # Mirror torch's try/except: a shape-incompatible optional output contributes 0.
    has_snn = ('snn_output' in outputs
               and outputs['snn_output'].shape == targets.shape)
    cnn_mode = None
    if 'cnn_output' in outputs:
        cnn_out = outputs['cnn_output']
        if cnn_out.ndim == 4 and cnn_out.shape == targets.shape[:-1]:
            cnn_mode = "2d"
        elif cnn_out.shape == targets.shape:
            cnn_mode = "5d"
        # TODO(synk): torch's bare `except:` also swallows other broadcast failures;
        # any other cnn shape simply contributes 0, which is what cnn_mode=None gives.
    has_cnn = cnn_mode is not None
    n_terms = 1 + int(has_snn) + int(has_cnn)

    # Lane-dense flatten: (B,C,H,W,T) -> (M, W*T); contiguous, so it is free.
    out5 = outputs['output'].reshape(M, WT)
    tgt5 = targets.reshape(M, WT)

    inputs = [out5]
    if has_snn:
        inputs.append(outputs['snn_output'].reshape(M, WT))
    inputs.append(tgt5)
    if cnn_mode == "2d":
        inputs.append(outputs['cnn_output'].reshape(M, W))
        # Pooling matrix for mean over T along the flattened lane axis (DMA'd once).
        k_idx = jax.lax.broadcasted_iota(jnp.int32, (WT, W), 0)
        w_idx = jax.lax.broadcasted_iota(jnp.int32, (WT, W), 1)
        pool = jnp.where(k_idx // T == w_idx, jnp.float32(1.0 / T), jnp.float32(0.0))
        inputs.append(pool)
    elif cnn_mode == "5d":
        inputs.append(outputs['cnn_output'].reshape(M, WT))

    # --- per-generation VMEM budget & tile selection ------------------------
    vmem_phys = _tpu_vmem_bytes()
    # ~44 MiB of buffers on v7x (64 MiB/TC physical), more headroom on v5e/v6e (128 MiB).
    vmem_budget = min(vmem_phys * 7 // 10, 80 << 20)

    five_d_streams = [outputs['output'], targets]
    if has_snn:
        five_d_streams.append(outputs['snn_output'])
    if cnn_mode == "5d":
        five_d_streams.append(outputs['cnn_output'])
    max_item = max(x.dtype.itemsize for x in five_d_streams)

    row_bytes = sum(WT * x.dtype.itemsize for x in five_d_streams)
    if cnn_mode == "2d":
        row_bytes += W * outputs['cnn_output'].dtype.itemsize
    db_row_bytes = 2 * row_bytes                      # double-buffered input tiles / row

    est_fixed = (1 << 20)                             # compiler-internal headroom
    est_fixed += 8 * WT * 4 * (1 + int(has_snn))      # vreg-row accumulators
    if has_cnn:
        est_fixed += 8 * (W if cnn_mode == "2d" else WT) * 4
    if cnn_mode == "2d":
        est_fixed += 2 * WT * W * 4                   # pooling matrix (double-buffered)

    if tile_m is None:
        # ~4 MiB of native-dtype data per 5-D input stream per step (amortizes the
        # ~0.35 us/step overhead), bounded by the generation's VMEM budget.
        tile_m = (4 << 20) // (WT * max_item)
        tile_m = min(tile_m, max(8, (vmem_budget - est_fixed) // max(db_row_bytes, 1)))
        tile_m = max(8, (tile_m // 8) * 8)
    if tile_m >= M:
        tile_m = M            # single full block along M (full-dim block is always legal)
    else:
        assert tile_m % 8 == 0, "tile_m must be a multiple of 8 when it does not cover M"

    # --- chunk (TensorCore) axis --------------------------------------------
    total_tiles = pl.cdiv(M, tile_m)
    if n_chunks is None:
        n_chunks = _tpu_num_tensorcores()
    n_chunks_eff = max(1, min(int(n_chunks), total_tiles))

    # Avoid clamped (wasted re-read) slots: nudge tile_m down (staying a multiple of 8)
    # until the tile count splits evenly across chunks, if a nearby value achieves it.
    if n_chunks_eff > 1 and total_tiles % n_chunks_eff != 0 and tile_m < M:
        for cand in range(tile_m, max(8, tile_m - 8 * 16) - 1, -8):
            if pl.cdiv(M, cand) % n_chunks_eff == 0:
                tile_m = cand
                total_tiles = pl.cdiv(M, cand)
                break

    tiles_per_chunk = pl.cdiv(total_tiles, n_chunks_eff)
    grid_is_2d = n_chunks_eff > 1
    grid_tiles = n_chunks_eff * tiles_per_chunk if grid_is_2d else total_tiles
    needs_clamp = grid_is_2d and (grid_tiles != total_tiles)
    needs_mask = (grid_tiles * tile_m != M)
    n_inner = tiles_per_chunk if grid_is_2d else total_tiles

    # Accumulators: one vreg-row tall when tile_m is sublane-aligned, full tile otherwise
    # (only possible when tile_m == M and M % 8 != 0, i.e. a single tiny tile).
    acc_rows = 8 if tile_m % 8 == 0 else tile_m

    # --- VMEM limit from the actual buffer math ------------------------------
    fixed_bytes = (1 << 20)
    fixed_bytes += acc_rows * WT * 4 * (1 + int(has_snn))
    if has_cnn:
        fixed_bytes += acc_rows * (W if cnn_mode == "2d" else WT) * 4
    if cnn_mode == "2d":
        fixed_bytes += 2 * WT * W * 4
    fixed_bytes += n_terms * 2 * (8 * 128 * 4)        # tiny (padded) output blocks
    usage = db_row_bytes * tile_m + fixed_bytes
    vmem_limit = min(vmem_phys * 3 // 4,
                     max(16 << 20, usage * 5 // 4 + (2 << 20)))

    # --- specs ----------------------------------------------------------------
    if grid_is_2d:
        if needs_clamp:
            blk = lambda c, i: jnp.minimum(c * tiles_per_chunk + i, total_tiles - 1)
        else:
            blk = lambda c, i: c * tiles_per_chunk + i
        spec5 = pl.BlockSpec((tile_m, WT), lambda c, i: (blk(c, i), 0))
        spec_cnn2d = pl.BlockSpec((tile_m, W), lambda c, i: (blk(c, i), 0))
        spec_pool = pl.BlockSpec((WT, W), lambda c, i: (0, 0))
        out_spec = pl.BlockSpec((1, 1, 1), lambda c, i: (c, 0, 0))
        grid = (n_chunks_eff, tiles_per_chunk)
        core_parallel = getattr(pltpu, "CORE_PARALLEL", None)
        chunk_sem = (core_parallel
                     if (core_parallel is not None and _tpu_num_tensorcores() > 1)
                     else "parallel")
        dim_sem = (chunk_sem, "arbitrary")
    else:
        spec5 = pl.BlockSpec((tile_m, WT), lambda i: (i, 0))
        spec_cnn2d = pl.BlockSpec((tile_m, W), lambda i: (i, 0))
        spec_pool = pl.BlockSpec((WT, W), lambda i: (0, 0))
        out_spec = pl.BlockSpec((1, 1, 1), lambda i: (0, 0, 0))
        grid = (total_tiles,)
        dim_sem = ("arbitrary",)

    in_specs = [spec5]
    if has_snn:
        in_specs.append(spec5)
    in_specs.append(spec5)
    if cnn_mode == "2d":
        in_specs.append(spec_cnn2d)
        in_specs.append(spec_pool)
    elif cnn_mode == "5d":
        in_specs.append(spec5)

    out_shapes = tuple(jax.ShapeDtypeStruct((n_chunks_eff, 1, 1), jnp.float32)
                       for _ in range(n_terms))

    scratch = [pltpu.VMEM((acc_rows, WT), jnp.float32)]
    if has_snn:
        scratch.append(pltpu.VMEM((acc_rows, WT), jnp.float32))
    if cnn_mode == "2d":
        scratch.append(pltpu.VMEM((acc_rows, W), jnp.float32))
    elif cnn_mode == "5d":
        scratch.append(pltpu.VMEM((acc_rows, WT), jnp.float32))

    kernel = _make_loss_kernel(
        has_snn=has_snn, cnn_mode=cnn_mode, tile_m=tile_m, m_rows=M,
        acc_rows=acc_rows, tiles_per_chunk=tiles_per_chunk, n_inner=n_inner,
        needs_mask=needs_mask, grid_is_2d=grid_is_2d, total_tiles=total_tiles)

    bytes_accessed = sum(int(x.size) * x.dtype.itemsize for x in inputs) \
        + n_terms * n_chunks_eff * 4
    flops = 3 * M * WT * (1 + int(has_snn))
    if cnn_mode == "2d":
        flops += 2 * M * WT * W + 3 * M * W
    elif cnn_mode == "5d":
        flops += 3 * M * WT
    cost = pl.CostEstimate(flops=int(flops), transcendentals=0,
                           bytes_accessed=int(bytes_accessed))

    sums = pl.pallas_call(
        kernel,
        out_shape=out_shapes,
        grid_spec=pltpu.PrefetchScalarGridSpec(
            num_scalar_prefetch=0,
            grid=grid,
            in_specs=in_specs,
            out_specs=tuple(out_spec for _ in range(n_terms)),
            scratch_shapes=scratch,
        ),
        compiler_params=pltpu.CompilerParams(
            dimension_semantics=dim_sem,
            vmem_limit_bytes=int(vmem_limit),
        ),
        cost_estimate=cost,
    )(*inputs)

    idx = 0
    main_sum = jnp.sum(sums[idx]); idx += 1
    if has_snn:
        snn_sum = jnp.sum(sums[idx]); idx += 1
    if has_cnn:
        cnn_sum = jnp.sum(sums[idx]); idx += 1

    n5 = jnp.float32(M * WT)
    main_loss = main_sum / n5
    snn_loss = (snn_sum / n5) * jnp.float32(0.5) if has_snn else jnp.float32(0.0)
    if has_cnn:
        cnn_den = jnp.float32(M * W) if cnn_mode == "2d" else n5
        cnn_loss = (cnn_sum / cnn_den) * jnp.float32(0.3)
    else:
        cnn_loss = jnp.float32(0.0)
    total_loss = main_loss + snn_loss + cnn_loss
    return {
        'total_loss': total_loss,
        'main_loss': main_loss,
        'snn_loss': snn_loss,
        'cnn_loss': cnn_loss,
    }


# ----------------------------------------------------------------------------- reference & tests
def _reference(outputs, targets):
    """Pure-JAX reference mirroring the torch module's semantics."""
    mse = lambda a, b: jnp.mean((a.astype(jnp.float32) - b.astype(jnp.float32)) ** 2)
    main = mse(outputs['output'], targets)
    snn = jnp.float32(0.0)
    if 'snn_output' in outputs and outputs['snn_output'].shape == targets.shape:
        snn = mse(outputs['snn_output'], targets) * 0.5
    cnn = jnp.float32(0.0)
    if 'cnn_output' in outputs:
        c = outputs['cnn_output']
        if c.ndim == 4 and c.shape == targets.shape[:-1]:
            cnn = mse(c, targets.mean(axis=-1)) * 0.3
        elif c.shape == targets.shape:
            cnn = mse(c, targets) * 0.3
    return {'total_loss': main + snn + cnn, 'main_loss': main,
            'snn_loss': snn, 'cnn_loss': cnn}


if __name__ == "__main__":
    # Small shapes consistent with the module: (B, C, H, W, T) targets, (B, C, H, W) cnn_output.
    B, C, H, W, T = 2, 4, 16, 16, 8
    key = jax.random.PRNGKey(0)
    k1, k2, k3, k4 = jax.random.split(key, 4)

    targets = jax.random.normal(k1, (B, C, H, W, T), dtype=jnp.float32)
    outputs = {
        'output': jax.random.normal(k2, (B, C, H, W, T), dtype=jnp.float32),
        'snn_output': jax.random.normal(k3, (B, C, H, W, T), dtype=jnp.float32),
        'cnn_output': jax.random.normal(k4, (B, C, H, W), dtype=jnp.float32),
    }

    def check(got, ref):
        for name in ('main_loss', 'snn_loss', 'cnn_loss', 'total_loss'):
            assert jnp.allclose(got[name], ref[name], rtol=1e-5, atol=1e-5), (
                name, got[name], ref[name])

    # 1) Full dual-channel loss, auto tiling / auto chunk count (1-D grid on 1-TC chips).
    losses = robust_dual_channel_loss(outputs, targets)
    jax.block_until_ready(losses['total_loss'])
    check(losses, _reference(outputs, targets))

    # 2) Small tile that does NOT divide M with an explicit 2-chunk grid: exercises the
    #    2-D grid, tail-row masking and clamped over-provisioned grid slots.
    losses_tiled = robust_dual_channel_loss(outputs, targets, tile_m=48, n_chunks=2)
    jax.block_until_ready(losses_tiled['total_loss'])
    check(losses_tiled, _reference(outputs, targets))

    # 3) Evenly-dividing multi-tile 1-D grid: exercises the vreg-row fold accumulation
    #    across several unmasked steps.
    losses_even = robust_dual_channel_loss(outputs, targets, tile_m=32, n_chunks=1)
    jax.block_until_ready(losses_even['total_loss'])
    check(losses_even, _reference(outputs, targets))

    # 4) Main-term-only variant (specialized kernel; no dummy inputs / extra DMA).
    outputs_main_only = {'output': outputs['output']}
    losses_main = robust_dual_channel_loss(outputs_main_only, targets)
    jax.block_until_ready(losses_main['total_loss'])
    check(losses_main, _reference(outputs_main_only, targets))

    # 5) cnn_output already target-shaped (torch else-branch) and a shape-incompatible
    #    snn_output (torch try/except -> contributes 0).
    outputs_alt = {
        'output': outputs['output'],
        'snn_output': outputs['snn_output'][..., : T - 1],   # incompatible -> dropped
        'cnn_output': jax.random.normal(k4, (B, C, H, W, T), dtype=jnp.float32),
    }
    losses_alt = robust_dual_channel_loss(outputs_alt, targets)
    jax.block_until_ready(losses_alt['total_loss'])
    check(losses_alt, _reference(outputs_alt, targets))

    print("KERNEL_OK")
</pallas_src>

<mosaic_0001>
module attributes {stable_mosaic.version = 11 : i64} {
  func.func @kernel(%arg0: i32, %arg1: memref<128x128xf32, #tpu.memory_space<vmem>>, %arg2: memref<128x128xf32, #tpu.memory_space<vmem>>, %arg3: memref<128x128xf32, #tpu.memory_space<vmem>>, %arg4: memref<128x16xf32, #tpu.memory_space<vmem>>, %arg5: memref<128x16xf32, #tpu.memory_space<vmem>>, %arg6: memref<1x1x1xf32, #tpu.memory_space<vmem>>, %arg7: memref<1x1x1xf32, #tpu.memory_space<vmem>>, %arg8: memref<1x1x1xf32, #tpu.memory_space<vmem>>, %arg9: memref<8x128xf32, #tpu.memory_space<vmem>>, %arg10: memref<8x128xf32, #tpu.memory_space<vmem>>, %arg11: memref<8x16xf32, #tpu.memory_space<vmem>>) attributes {dimension_semantics = [#tpu.dimension_semantics<arbitrary>], iteration_bounds = array<i64: 1>, scalar_prefetch = 0 : i64, scratch_operands = 3 : i64, tpu.core_type = #tpu.core_type<tc>, window_params = [{transform_indices = @transform_0, window_bounds = array<i64: 128, 128>}, {transform_indices = @transform_1, window_bounds = array<i64: 128, 128>}, {transform_indices = @transform_2, window_bounds = array<i64: 128, 128>}, {transform_indices = @transform_3, window_bounds = array<i64: 128, 16>}, {pipeline_mode = #tpu.pipeline_mode<synchronous>, transform_indices = @transform_4, window_bounds = array<i64: 128, 16>}, {pipeline_mode = #tpu.pipeline_mode<synchronous>, transform_indices = @transform_5, window_bounds = array<i64: 1, 1, 1>}, {pipeline_mode = #tpu.pipeline_mode<synchronous>, transform_indices = @transform_6, window_bounds = array<i64: 1, 1, 1>}, {pipeline_mode = #tpu.pipeline_mode<synchronous>, transform_indices = @transform_7, window_bounds = array<i64: 1, 1, 1>}]} {
    %c0_i32 = arith.constant 0 : i32
    %0 = arith.cmpi eq, %arg0, %c0_i32 : i32
    %1 = arith.extui %0 : i1 to i32
    %c0_i32_0 = arith.constant 0 : i32
    %2 = arith.cmpi ne, %1, %c0_i32_0 : i32
    scf.if %2 {
      %cst_27 = arith.constant 0.000000e+00 : f32
      %33 = vector.broadcast %cst_27 : f32 to vector<8x128xf32>
      %c0_28 = arith.constant 0 : index
      %c0_29 = arith.constant 0 : index
      %34 = vector.load %arg9[%c0_28, %c0_29] : memref<8x128xf32, #tpu.memory_space<vmem>>, vector<8x128xf32>
      tpu.vector_store %arg9[%c0_28, %c0_29], %33 {strides = array<i32>} : memref<8x128xf32, #tpu.memory_space<vmem>>, vector<8x128xf32>,
      %cst_30 = arith.constant 0.000000e+00 : f32
      %35 = vector.broadcast %cst_30 : f32 to vector<8x128xf32>
      %c0_31 = arith.constant 0 : index
      %c0_32 = arith.constant 0 : index
      %36 = vector.load %arg10[%c0_31, %c0_32] : memref<8x128xf32, #tpu.memory_space<vmem>>, vector<8x128xf32>
      tpu.vector_store %arg10[%c0_31, %c0_32], %35 {strides = array<i32>} : memref<8x128xf32, #tpu.memory_space<vmem>>, vector<8x128xf32>,
      %cst_33 = arith.constant 0.000000e+00 : f32
      %37 = vector.broadcast %cst_33 : f32 to vector<8x16xf32>
      %c0_34 = arith.constant 0 : index
      %c0_35 = arith.constant 0 : index
      %38 = vector.load %arg11[%c0_34, %c0_35] : memref<8x16xf32, #tpu.memory_space<vmem>>, vector<8x16xf32>
      tpu.vector_store %arg11[%c0_34, %c0_35], %37 {strides = array<i32>} : memref<8x16xf32, #tpu.memory_space<vmem>>, vector<8x16xf32>,
    } else {
    }
    %c0 = arith.constant 0 : index
    %c0_1 = arith.constant 0 : index
    %3 = vector.load %arg3[%c0, %c0_1] : memref<128x128xf32, #tpu.memory_space<vmem>>, vector<128x128xf32>
    %c0_2 = arith.constant 0 : index
    %c0_3 = arith.constant 0 : index
    %4 = vector.load %arg1[%c0_2, %c0_3] : memref<128x128xf32, #tpu.memory_space<vmem>>, vector<128x128xf32>
    %5 = arith.subf %4, %3 : vector<128x128xf32>
    %6 = arith.mulf %5, %5 : vector<128x128xf32>
    %c0_4 = arith.constant 0 : index
    %c0_5 = arith.constant 0 : index
    %7 = vector.load %arg2[%c0_4, %c0_5] : memref<128x128xf32, #tpu.memory_space<vmem>>, vector<128x128xf32>
    %8 = arith.subf %7, %3 : vector<128x128xf32>
    %9 = arith.mulf %8, %8 : vector<128x128xf32>
    %c0_6 = arith.constant 0 : index
    %c0_7 = arith.constant 0 : index
    %10 = vector.load %arg5[%c0_6, %c0_7] : memref<128x16xf32, #tpu.memory_space<vmem>>, vector<128x16xf32>
    %cst = arith.constant dense<0.000000e+00> : vector<128x16xf32>
    %11 = tpu.matmul %3, %10, %cst {dimension_numbers = #tpu.dot_dimension_numbers<[1], [0], [0], [1], [0, 0, 1, 1], [], []>} : vector<128x128xf32>, vector<128x16xf32>, vector<128x16xf32> -> vector<128x16xf32>
    %c0_8 = arith.constant 0 : index
    %c0_9 = arith.constant 0 : index
    %12 = vector.load %arg4[%c0_8, %c0_9] : memref<128x16xf32, #tpu.memory_space<vmem>>, vector<128x16xf32>
    %13 = arith.subf %12, %11 : vector<128x16xf32>
    %14 = arith.mulf %13, %13 : vector<128x16xf32>
    %c0_10 = arith.constant 0 : index
    %c0_11 = arith.constant 0 : index
    %15 = vector.load %arg9[%c0_10, %c0_11] : memref<8x128xf32, #tpu.memory_space<vmem>>, vector<8x128xf32>
    %16 = vector.shape_cast %6 : vector<128x128xf32> to vector<16x8x128xf32>
    %cst_12 = arith.constant dense<0.000000e+00> : vector<8x128xf32>
    %17 = vector.multi_reduction <add>, %16, %cst_12 [0] : vector<16x8x128xf32> to vector<8x128xf32>
    %18 = arith.addf %15, %17 : vector<8x128xf32>
    %c0_13 = arith.constant 0 : index
    %c0_14 = arith.constant 0 : index
    %19 = vector.load %arg9[%c0_13, %c0_14] : memref<8x128xf32, #tpu.memory_space<vmem>>, vector<8x128xf32>
    tpu.vector_store %arg9[%c0_13, %c0_14], %18 {strides = array<i32>} : memref<8x128xf32, #tpu.memory_space<vmem>>, vector<8x128xf32>,
    %c0_15 = arith.constant 0 : index
    %c0_16 = arith.constant 0 : index
    %20 = vector.load %arg10[%c0_15, %c0_16] : memref<8x128xf32, #tpu.memory_space<vmem>>, vector<8x128xf32>
    %21 = vector.shape_cast %9 : vector<128x128xf32> to vector<16x8x128xf32>
    %cst_17 = arith.constant dense<0.000000e+00> : vector<8x128xf32>
    %22 = vector.multi_reduction <add>, %21, %cst_17 [0] : vector<16x8x128xf32> to vector<8x128xf32>
    %23 = arith.addf %20, %22 : vector<8x128xf32>
    %c0_18 = arith.constant 0 : index
    %c0_19 = arith.constant 0 : index
    %24 = vector.load %arg10[%c0_18, %c0_19] : memref<8x128xf32, #tpu.memory_space<vmem>>, vector<8x128xf32>
    tpu.vector_store %arg10[%c0_18, %c0_19], %23 {strides = array<i32>} : memref<8x128xf32, #tpu.memory_space<vmem>>, vector<8x128xf32>,
    %c0_20 = arith.constant 0 : index
    %c0_21 = arith.constant 0 : index
    %25 = vector.load %arg11[%c0_20, %c0_21] : memref<8x16xf32, #tpu.memory_space<vmem>>, vector<8x16xf32>
    %26 = vector.shape_cast %14 : vector<128x16xf32> to vector<16x8x16xf32>
    %cst_22 = arith.constant dense<0.000000e+00> : vector<8x16xf32>
    %27 = vector.multi_reduction <add>, %26, %cst_22 [0] : vector<16x8x16xf32> to vector<8x16xf32>
    %28 = arith.addf %25, %27 : vector<8x16xf32>
    %c0_23 = arith.constant 0 : index
    %c0_24 = arith.constant 0 : index
    %29 = vector.load %arg11[%c0_23, %c0_24] : memref<8x16xf32, #tpu.memory_space<vmem>>, vector<8x16xf32>
    tpu.vector_store %arg11[%c0_23, %c0_24], %28 {strides = array<i32>} : memref<8x16xf32, #tpu.memory_space<vmem>>, vector<8x16xf32>,
    %c0_i32_25 = arith.constant 0 : i32
    %30 = arith.cmpi eq, %arg0, %c0_i32_25 : i32
    %31 = arith.extui %30 : i1 to i32
    %c0_i32_26 = arith.constant 0 : i32
    %32 = arith.cmpi ne, %31, %c0_i32_26 : i32
    scf.if %32 {
      %cst_27 = arith.constant 0.000000e+00 : f32
      %33 = vector.broadcast %cst_27 : f32 to vector<1x1x1xf32>
      %c0_28 = arith.constant 0 : index
      %c0_29 = arith.constant 0 : index
      %34 = vector.load %arg9[%c0_28, %c0_29] : memref<8x128xf32, #tpu.memory_space<vmem>>, vector<8x128xf32>
      %35 = vector.shape_cast %34 : vector<8x128xf32> to vector<1x8x128xf32>
      %cst_30 = arith.constant dense<0.000000e+00> : vector<1xf32>
      %36 = vector.multi_reduction <add>, %35, %cst_30 [1, 2] : vector<1x8x128xf32> to vector<1xf32>
      %37 = vector.shape_cast %36 : vector<1xf32> to vector<1x1x1xf32>
      %38 = vector.extract %37[0, 0, 0] : f32 from vector<1x1x1xf32>
      %39 = vector.broadcast %38 : f32 to vector<1x1x1xf32>
      %40 = arith.addf %33, %39 : vector<1x1x1xf32>
      %c0_31 = arith.constant 0 : index
      %c0_32 = arith.constant 0 : index
      %c0_33 = arith.constant 0 : index
      %41 = vector.load %arg6[%c0_31, %c0_32, %c0_33] : memref<1x1x1xf32, #tpu.memory_space<vmem>>, vector<1x1x1xf32>
      tpu.vector_store %arg6[%c0_31, %c0_32, %c0_33], %40 {strides = array<i32>} : memref<1x1x1xf32, #tpu.memory_space<vmem>>, vector<1x1x1xf32>,
      %cst_34 = arith.constant 0.000000e+00 : f32
      %42 = vector.broadcast %cst_34 : f32 to vector<1x1x1xf32>
      %c0_35 = arith.constant 0 : index
      %c0_36 = arith.constant 0 : index
      %43 = vector.load %arg10[%c0_35, %c0_36] : memref<8x128xf32, #tpu.memory_space<vmem>>, vector<8x128xf32>
      %44 = vector.shape_cast %43 : vector<8x128xf32> to vector<1x8x128xf32>
      %cst_37 = arith.constant dense<0.000000e+00> : vector<1xf32>
      %45 = vector.multi_reduction <add>, %44, %cst_37 [1, 2] : vector<1x8x128xf32> to vector<1xf32>
      %46 = vector.shape_cast %45 : vector<1xf32> to vector<1x1x1xf32>
      %47 = vector.extract %46[0, 0, 0] : f32 from vector<1x1x1xf32>
      %48 = vector.broadcast %47 : f32 to vector<1x1x1xf32>
      %49 = arith.addf %42, %48 : vector<1x1x1xf32>
      %c0_38 = arith.constant 0 : index
      %c0_39 = arith.constant 0 : index
      %c0_40 = arith.constant 0 : index
      %50 = vector.load %arg7[%c0_38, %c0_39, %c0_40] : memref<1x1x1xf32, #tpu.memory_space<vmem>>, vector<1x1x1xf32>
      tpu.vector_store %arg7[%c0_38, %c0_39, %c0_40], %49 {strides = array<i32>} : memref<1x1x1xf32, #tpu.memory_space<vmem>>, vector<1x1x1xf32>,
      %cst_41 = arith.constant 0.000000e+00 : f32
      %51 = vector.broadcast %cst_41 : f32 to vector<1x1x1xf32>
      %c0_42 = arith.constant 0 : index
      %c0_43 = arith.constant 0 : index
      %52 = vector.load %arg11[%c0_42, %c0_43] : memref<8x16xf32, #tpu.memory_space<vmem>>, vector<8x16xf32>
      %53 = vector.shape_cast %52 : vector<8x16xf32> to vector<1x8x16xf32>
      %cst_44 = arith.constant dense<0.000000e+00> : vector<1xf32>
      %54 = vector.multi_reduction <add>, %53, %cst_44 [1, 2] : vector<1x8x16xf32> to vector<1xf32>
      %55 = vector.shape_cast %54 : vector<1xf32> to vector<1x1x1xf32>
      %56 = vector.extract %55[0, 0, 0] : f32 from vector<1x1x1xf32>
      %57 = vector.broadcast %56 : f32 to vector<1x1x1xf32>
      %58 = arith.addf %51, %57 : vector<1x1x1xf32>
      %c0_45 = arith.constant 0 : index
      %c0_46 = arith.constant 0 : index
      %c0_47 = arith.constant 0 : index
      %59 = vector.load %arg8[%c0_45, %c0_46, %c0_47] : memref<1x1x1xf32, #tpu.memory_space<vmem>>, vector<1x1x1xf32>
      tpu.vector_store %arg8[%c0_45, %c0_46, %c0_47], %58 {strides = array<i32>} : memref<1x1x1xf32, #tpu.memory_space<vmem>>, vector<1x1x1xf32>,
    } else {
    }
    return
  }
  func.func @transform_0(%arg0: i32) -> (i32, i32) {
    %c0_i32 = arith.constant 0 : i32
    %c0_i32_0 = arith.constant 0 : i32
    return %arg0, %c0_i32 : i32, i32
  }
  func.func @transform_1(%arg0: i32) -> (i32, i32) {
    %c0_i32 = arith.constant 0 : i32
    %c0_i32_0 = arith.constant 0 : i32
    return %arg0, %c0_i32 : i32, i32
  }
  func.func @transform_2(%arg0: i32) -> (i32, i32) {
    %c0_i32 = arith.constant 0 : i32
    %c0_i32_0 = arith.constant 0 : i32
    return %arg0, %c0_i32 : i32, i32
  }
  func.func @transform_3(%arg0: i32) -> (i32, i32) {
    %c0_i32 = arith.constant 0 : i32
    %c0_i32_0 = arith.constant 0 : i32
    return %arg0, %c0_i32 : i32, i32
  }
  func.func @transform_4(%arg0: i32) -> (i32, i32) {
    %c0_i32 = arith.constant 0 : i32
    %c0_i32_0 = arith.constant 0 : i32
    %c0_i32_1 = arith.constant 0 : i32
    return %c0_i32, %c0_i32_0 : i32, i32
  }
  func.func @transform_5(%arg0: i32) -> (i32, i32, i32) {
    %c0_i32 = arith.constant 0 : i32
    %c0_i32_0 = arith.constant 0 : i32
    %c0_i32_1 = arith.constant 0 : i32
    %c0_i32_2 = arith.constant 0 : i32
    return %c0_i32, %c0_i32_0, %c0_i32_1 : i32, i32, i32
  }
  func.func @transform_6(%arg0: i32) -> (i32, i32, i32) {
    %c0_i32 = arith.constant 0 : i32
    %c0_i32_0 = arith.constant 0 : i32
    %c0_i32_1 = arith.constant 0 : i32
    %c0_i32_2 = arith.constant 0 : i32
    return %c0_i32, %c0_i32_0, %c0_i32_1 : i32, i32, i32
  }
  func.func @transform_7(%arg0: i32) -> (i32, i32, i32) {
    %c0_i32 = arith.constant 0 : i32
    %c0_i32_0 = arith.constant 0 : i32
    %c0_i32_1 = arith.constant 0 : i32
    %c0_i32_2 = arith.constant 0 : i32
    return %c0_i32, %c0_i32_0, %c0_i32_1 : i32, i32, i32
  }
}

</mosaic_0001>

<bundles_post_ra>
// kernel: tpu_custom_call.1
= control target key start
LH: loop header
LB: loop body
LE: loop exit
PB: predicated region body
PF: predicated region fallthrough
CT: control target
= control target key end

     0   :  { %13 = vsyncpa [#allocation6], 0  ;;  %s1124_s0 = inlined_call_operand.vmem [shape: f32[128,128], index: 0, kind: input, shape index: {}]   ;;  %s1125_s1 = inlined_call_operand.vmem [shape: f32[128,128], index: 1, kind: input, shape index: {}]   ;;  %s1126_s2 = inlined_call_operand.hbm [shape: f32[128,128], index: 2, kind: input, shape index: {}]   ;;  %s1127_s3 = inlined_call_operand.vmem [shape: f32[128,16], index: 3, kind: input, shape index: {}]   ;;  %s1128_s4 = inlined_call_operand.vmem [shape: f32[128,16], index: 4, kind: input, shape index: {}]   ;;  %s1129_s5 = inlined_call_operand.hbm [shape: f32[1,1,1], index: 5, kind: output, shape index: {0}]   ;;  %s1130_s6 = inlined_call_operand.hbm [shape: f32[1,1,1], index: 6, kind: output, shape index: {1}]   ;;  %s1131_s7 = inlined_call_operand.hbm [shape: f32[1,1,1], index: 7, kind: output, shape index: {2}]  }
   0x1   :  { %14 = vsyncpa [#allocation7], 0 }
   0x2   :  { %15 = vsyncpa [#allocation10], 0  ;;  %s768_s24 = smov [#allocation5]   ;;  %s674_s28 = scalar_lea.hbm %s1126_s2, 2048 }
   0x3   :  { %s25_s25 = sshll.u32 %s768_s24, 4  ;;  %p675_p0 = scmp.ne.s32.totalorder %s1126_s2, %s674_s28  ;;  %s26_s25 = int_to_ptr.vmem [resolvable:$true] %s25_s25 }
   0x4   :  { %p678_p1 = scmp.lt.u32.totalorder %s674_s28, %s1126_s2 }
   0x6   :  { %p680_p2 = pnand %p678_p1, %p675_p0 }
   0x8   :  { %683 = shalt.err (!%p680_p2)
}
   0x9   :  { %s684_s10 = scalar_lea.vmem %s26_s25, 2048  ;;  %p689_p4 = scmp.lt.s32.totalorder %s26_s25, %s26_s25 }
   0xa   :  { %p685_p3 = scmp.ne.s32.totalorder %s26_s25, %s684_s10  ;;  %p690_p5 = scmp.lt.s32.totalorder %s684_s10, %s684_s10 }
   0xc   :  { %p691_p6 = por %p690_p5, %p689_p4 }
   0xe   :  { %p692_p7 = pnand %p691_p6, %p685_p3 }
  0x10   :  { %695 = shalt.err (!%p692_p7)
}
  0x11   :  { %s769_s11 = smov 128   ;;  %s770_s12 = smov 8  }
  0x12   :  { %31 = dma.hbm_to_vmem [thread:$0]  %s1126_s2, 2048, %s26_s25, [#allocation6], %s769_s11, %s769_s11, %s770_s12  }
  0x13   :  { %762 = dma.done.wait [#allocation6], 2048  }
  0x14   :  { %763 = vsyncadd [#allocation6], 4294965248  ;;  %v159_v0 = vld [vmem:[%s1128_s4] sm:$0xff]  ;;  %v160_v1 = vld [vmem:[%s1128_s4 + $0x8] sm:$0xff]  ;;  %vm45_vm0 = vcmask 130048   ;;  %vm454_vm1 = vcmask 0  }
  0x15   :  { %v161_v2 = vld [vmem:[%s1128_s4 + $0x10] sm:$0xff]  ;;  %v613_v3 = vpack.c.bf16 %v160_v1, %v159_v0  ;;  %v162_v4 = vld [vmem:[%s1128_s4 + $0x18] sm:$0xff]  ;;  %v163_v6 = vld [vmem:[%s1128_s4 + $0x20] sm:$0xff]  ;;  %s772_s18 = smov [#allocation9]   ;;  %s773_s20 = smov [#allocation8]  }
  0x16   :  { %v617_v5 = vpack.c.bf16 %v162_v4, %v161_v2  ;;  %v164_v7 = vld [vmem:[%s1128_s4 + $0x28] sm:$0xff]  ;;  %v165_v8 = vld [vmem:[%s1128_s4 + $0x30] sm:$0xff]  ;;  %v166_v9 = vld [vmem:[%s1128_s4 + $0x38] sm:$0xff]  ;;  %s499_s19 = sshll.u32 %s772_s18, 4  ;;  %s489_s21 = sshll.u32 %s773_s20, 4  ;;  %s500_s19 = int_to_ptr.vmem [resolvable:$true] %s499_s19  ;;  %s490_s21 = int_to_ptr.vmem [resolvable:$true] %s489_s21 }
  0x17   :  { %614 = vmatprep.subr.bf16.mxu0 %v613_v3  ;;  %645 = vmatprep.subr.bf16.mxu1 %v613_v3  ;;  %v167_v10 = vld [vmem:[%s1128_s4 + $0x40] sm:$0xff]  ;;  %v168_v11 = vld [vmem:[%s1128_s4 + $0x48] sm:$0xff]  ;;  %v621_v12 = vpack.c.bf16 %v164_v7, %v163_v6  ;;  %v863_v17 = vld [vmem:[#allocation5 + $0x8] sm:$0xff]  ;;  %v868_v19 = vpack.c.bf16 %v166_v9, %v165_v8  ;;  %s696_s22 = scalar_lea.vmem %s500_s19, 16  ;;  %s700_s2 = scalar_lea.vmem %s500_s19, 32 }
  0x18   :  { %616 = vmatpush3.bf16.msra.mxu0 %v613_v3  ;;  %653 = vmatpush3.bf16.msra.mxu1 %v613_v3  ;;  %v47_v13 = vld [vmem:[#allocation5] sm:$0xff]  ;;  %v63_v14 = vld [vmem:[%s1124_s0] sm:$0xff]  ;;  %v870_v20 = vpack.c.bf16 %v168_v11, %v167_v10  ;;  %v876_v24 = vld [vmem:[#allocation5 + $0x10] sm:$0xff]  ;;  %p697_p8 = scmp.ne.s32.totalorder %s500_s19, %s696_s22  ;;  %p701_p9 = scmp.lt.s32.totalorder %s500_s19, %s500_s19 }
  0x19   :  { %618 = vmatprep.subr.bf16.mxu0 %v617_v5  ;;  %646 = vmatprep.subr.bf16.mxu1 %v617_v5  ;;  %v79_v15 = vsub.f32 %v63_v14, %v47_v13  ;;  %v111_v16 = vld [vmem:[%s1125_s1] sm:$0xff]  ;;  %v64_v18 = vld [vmem:[%s1124_s0 + $0x8] sm:$0xff]  ;;  %v65_v25 = vld [vmem:[%s1124_s0 + $0x10] sm:$0xff]  ;;  %p702_p10 = scmp.lt.s32.totalorder %s700_s2, %s696_s22 }
  0x1a   :  { %589 = vmatprep.mubr.f32.mxu0 %v47_v13  ;;  %v127_v21 = vsub.f32 %v111_v16, %v47_v13  ;;  %v80_v22 = vsub.f32 %v64_v18, %v863_v17  ;;  %v112_v23 = vld [vmem:[%s1125_s1 + $0x8] sm:$0xff]  ;;  %v81_v28 = vsub.f32 %v65_v25, %v876_v24  ;;  %v113_v29 = vld [vmem:[%s1125_s1 + $0x10] sm:$0xff]  ;;  %v66_v30 = vld [vmem:[%s1124_s0 + $0x18] sm:$0xff] }
  0x1b   :  { %v95_v26 = vmul.f32 %v79_v15, %v79_v15  ;;  %v128_v27 = vsub.f32 %v112_v23, %v863_v17  ;;  %v129_v33 = vsub.f32 %v113_v29, %v876_v24  ;;  %v890_v34 = vld [vmem:[#allocation5 + $0x18] sm:$0xff]  ;;  %v114_v35 = vld [vmem:[%s1125_s1 + $0x18] sm:$0xff]  ;;  %v900_v41 = vld [vmem:[#allocation5 + $0x20] sm:$0xff]  ;;  %p703_p11 = por %p702_p10, %p701_p9 }
  0x1c   :  { %620 = vmatpush3.bf16.msra.mxu0 %v617_v5  ;;  %654 = vmatpush3.bf16.msra.mxu1 %v617_v5  ;;  %v143_v31 = vmul.f32 %v127_v21, %v127_v21  ;;  %v96_v32 = vmul.f32 %v80_v22, %v80_v22  ;;  %v67_v36 = vld [vmem:[%s1124_s0 + $0x20] sm:$0xff]  ;;  %v97_v38 = vmul.f32 %v81_v28, %v81_v28  ;;  %v68_v47 = vld [vmem:[%s1124_s0 + $0x28] sm:$0xff]  ;;  %v69_v49 = vld [vmem:[%s1124_s0 + $0x30] sm:$0xff] }
  0x1d   :  { %622 = vmatprep.subr.bf16.mxu0 %v621_v12  ;;  %647 = vmatprep.subr.bf16.mxu1 %v621_v12  ;;  %v144_v37 = vmul.f32 %v128_v27, %v128_v27  ;;  %v82_v39 = vsub.f32 %v66_v30, %v890_v34  ;;  %v130_v40 = vsub.f32 %v114_v35, %v890_v34  ;;  %v115_v42 = vld [vmem:[%s1125_s1 + $0x20] sm:$0xff]  ;;  %v116_v48 = vld [vmem:[%s1125_s1 + $0x28] sm:$0xff]  ;;  %v916_v53 = vld [vmem:[#allocation5 + $0x28] sm:$0xff]  ;;  %p704_p12 = pnand %p703_p11, %p697_p8 }
  0x1e   :  { %v369_v43 = vadd.f32 %v96_v32, %v95_v26  ;;  %v145_v44 = vmul.f32 %v129_v33, %v129_v33  ;;  %v83_v45 = vsub.f32 %v67_v36, %v900_v41  ;;  %v131_v46 = vsub.f32 %v115_v42, %v900_v41  ;;  %v117_v54 = vld [vmem:[%s1125_s1 + $0x30] sm:$0xff]  ;;  %v70_v55 = vld [vmem:[%s1124_s0 + $0x38] sm:$0xff]  ;;  %v55_v61 = vld [vmem:[#allocation5 + $0x40] sm:$0xff] }
  0x1f   :  { %v387_v50 = vadd.f32 %v144_v37, %v143_v31  ;;  %v98_v51 = vmul.f32 %v82_v39, %v82_v39  ;;  %v146_v52 = vmul.f32 %v130_v40, %v130_v40  ;;  %v926_v59 = vld [vmem:[#allocation5 + $0x30] sm:$0xff]  ;;  %v169_v62 = vld [vmem:[%s1128_s4 + $0x50] sm:$0xff]  ;;  %v84_v1 = vsub.f32 %v68_v47, %v916_v53  ;;  %v940_v4 = vld [vmem:[#allocation5 + $0x38] sm:$0xff]  ;;  %601 = vmatprep.mubr.f32.mxu1 %v55_v61 }
  0x20   :  { %624 = vmatpush3.bf16.msra.mxu0 %v621_v12  ;;  %655 = vmatpush3.bf16.msra.mxu1 %v621_v12  ;;  %v370_v56 = vadd.f32 %v369_v43, %v97_v38  ;;  %v99_v57 = vmul.f32 %v83_v45, %v83_v45  ;;  %v147_v58 = vmul.f32 %v131_v46, %v131_v46  ;;  %v118_v60 = vld [vmem:[%s1125_s1 + $0x38] sm:$0xff]  ;;  %v171_v5 = vld [vmem:[%s1128_s4 + $0x60] sm:$0xff]  ;;  %v172_v6 = vld [vmem:[%s1128_s4 + $0x68] sm:$0xff] }
  0x21   :  { %626 = vmatprep.subr.bf16.mxu0 %v868_v19  ;;  %648 = vmatprep.subr.bf16.mxu1 %v868_v19  ;;  %v170_v63 = vld [vmem:[%s1128_s4 + $0x58] sm:$0xff]  ;;  %v388_v0 = vadd.f32 %v387_v50, %v145_v44  ;;  %v132_v2 = vsub.f32 %v116_v48, %v916_v53  ;;  %v85_v3 = vsub.f32 %v69_v49, %v926_v59  ;;  %v71_v11 = vld [vmem:[%s1124_s0 + $0x40] sm:$0xff]  ;;  %v72_v16 = vld [vmem:[%s1124_s0 + $0x48] sm:$0xff] }
  0x22   :  { %v371_v7 = vadd.f32 %v370_v56, %v98_v51  ;;  %v133_v8 = vsub.f32 %v117_v54, %v926_v59  ;;  %v86_v9 = vsub.f32 %v70_v55, %v940_v4  ;;  %v134_v10 = vsub.f32 %v118_v60, %v940_v4  ;;  %v119_v15 = vld [vmem:[%s1125_s1 + $0x40] sm:$0xff]  ;;  %v56_v28 = vld [vmem:[#allocation5 + $0x48] sm:$0xff]  ;;  %v57_v39 = vld [vmem:[#allocation5 + $0x50] sm:$0xff] }
  0x23   :  { %v389_v12 = vadd.f32 %v388_v0, %v146_v52  ;;  %v100_v13 = vmul.f32 %v84_v1, %v84_v1  ;;  %v148_v14 = vmul.f32 %v132_v2, %v132_v2  ;;  %v633_v18 = vpack.c.bf16 %v170_v63, %v169_v62  ;;  %v73_v29 = vld [vmem:[%s1124_s0 + $0x50] sm:$0xff]  ;;  %v74_v40 = vld [vmem:[%s1124_s0 + $0x58] sm:$0xff]  ;;  %v58_v50 = vld [vmem:[#allocation5 + $0x58] sm:$0xff] }
  0x24   :  { %628 = vmatpush3.bf16.msra.mxu0 %v868_v19  ;;  %656 = vmatpush3.bf16.msra.mxu1 %v868_v19  ;;  %v372_v21 = vadd.f32 %v371_v7, %v99_v57  ;;  %v101_v22 = vmul.f32 %v85_v3, %v85_v3  ;;  %v120_v19 = vld [vmem:[%s1125_s1 + $0x48] sm:$0xff]  ;;  %v637_v23 = vpack.c.bf16 %v172_v6, %v171_v5  ;;  %v121_v35 = vld [vmem:[%s1125_s1 + $0x50] sm:$0xff]  ;;  %v122_v45 = vld [vmem:[%s1125_s1 + $0x58] sm:$0xff] }
  0x25   :  { %630 = vmatprep.subr.bf16.mxu0 %v870_v20  ;;  %649 = vmatprep.subr.bf16.mxu1 %v870_v20  ;;  %v390_v25 = vadd.f32 %v389_v12, %v147_v58  ;;  %v149_v26 = vmul.f32 %v133_v8, %v133_v8  ;;  %v87_v27 = vsub.f32 %v71_v11, %v55_v61  ;;  %v174_v46 = vld [vmem:[%s1128_s4 + $0x78] sm:$0xff]  ;;  %v123_v55 = vld [vmem:[%s1125_s1 + $0x60] sm:$0xff]  ;;  %v59_v63 = vld [vmem:[#allocation5 + $0x60] sm:$0xff] }
  0x26   :  { %v373_v30 = vadd.f32 %v372_v21, %v100_v13  ;;  %v102_v31 = vmul.f32 %v86_v9, %v86_v9  ;;  %v135_v32 = vsub.f32 %v119_v15, %v55_v61  ;;  %v88_v33 = vsub.f32 %v72_v16, %v56_v28  ;;  %v61_v15 = vld [vmem:[#allocation5 + $0x70] sm:$0xff]  ;;  %v62_v16 = vld [vmem:[#allocation5 + $0x78] sm:$0xff] }
  0x27   :  { %v391_v36 = vadd.f32 %v390_v25, %v148_v14  ;;  %v150_v37 = vmul.f32 %v134_v10, %v134_v10  ;;  %v136_v38 = vsub.f32 %v120_v19, %v56_v28  ;;  %v103_v43 = vmul.f32 %v87_v27, %v87_v27  ;;  %v60_v14 = vld [vmem:[#allocation5 + $0x68] sm:$0xff]  ;;  %v78_v27 = vld [vmem:[%s1124_s0 + $0x78] sm:$0xff] }
  0x28   :  { %632 = vmatpush3.bf16.msra.mxu0 %v870_v20  ;;  %657 = vmatpush3.bf16.msra.mxu1 %v870_v20  ;;  %v374_v42 = vadd.f32 %v373_v30, %v101_v22  ;;  %v89_v44 = vsub.f32 %v73_v29, %v57_v39  ;;  %v173_v20 = vld [vmem:[%s1128_s4 + $0x70] sm:$0xff]  ;;  %v151_v48 = vmul.f32 %v135_v32, %v135_v32  ;;  %v771_v25 = vmov 0.0  }
  0x29   :  { %634 = vmatprep.subr.bf16.mxu0 %v633_v18  ;;  %650 = vmatprep.subr.bf16.mxu1 %v633_v18  ;;  %v392_v47 = vadd.f32 %v391_v36, %v149_v26  ;;  %v137_v49 = vsub.f32 %v121_v35, %v57_v39  ;;  %v104_v52 = vmul.f32 %v88_v33, %v88_v33  ;;  %v126_v36 = vld [vmem:[%s1125_s1 + $0x78] sm:$0xff] }
  0x2a   :  { %v375_v51 = vadd.f32 %v374_v42, %v102_v31  ;;  %v90_v54 = vsub.f32 %v74_v40, %v58_v50  ;;  %v152_v57 = vmul.f32 %v136_v38, %v136_v38  ;;  %v138_v58 = vsub.f32 %v122_v45, %v58_v50  ;;  %46 = vst.msk [vmem:[#allocation4] sm:$0xff] %vm45_vm0, %v771_v25  ;;  %v320_v45 = vld [vmem:[%s1127_s3] sm:$0xff] }
  0x2b   :  { %v393_v56 = vadd.f32 %v392_v47, %v150_v37  ;;  %v641_v60 = vpack.c.bf16 %v174_v46, %v173_v20  ;;  %v105_v62 = vmul.f32 %v89_v44, %v89_v44  ;;  %v153_v1 = vmul.f32 %v137_v49, %v137_v49  ;;  %v321_v44 = vld [vmem:[%s1127_s3 + $0x8] sm:$0xff] }
  0x2c   :  { %636 = vmatpush3.bf16.msra.mxu0 %v633_v18  ;;  %658 = vmatpush3.bf16.msra.mxu1 %v633_v18  ;;  %v376_v61 = vadd.f32 %v375_v51, %v103_v43  ;;  %v139_v2 = vsub.f32 %v123_v55, %v59_v63  ;;  %v106_v5 = vmul.f32 %v90_v54, %v90_v54  ;;  %v125_v18 = vld [vmem:[%s1125_s1 + $0x70] sm:$0xff]  ;;  %v323_v51 = vld [vmem:[%s1127_s3 + $0x18] sm:$0xff] }
  0x2d   :  { %638 = vmatprep.subr.bf16.mxu0 %v637_v23  ;;  %651 = vmatprep.subr.bf16.mxu1 %v637_v23  ;;  %v394_v0 = vadd.f32 %v393_v56, %v151_v48  ;;  %v154_v7 = vmul.f32 %v138_v58, %v138_v58  ;;  %v94_v29 = vsub.f32 %v78_v27, %v62_v16  ;;  %v322_v54 = vld [vmem:[%s1127_s3 + $0x10] sm:$0xff] }
  0x2e   :  { %v377_v3 = vadd.f32 %v376_v61, %v104_v52  ;;  %v155_v10 = vmul.f32 %v139_v2, %v139_v2  ;;  %v142_v38 = vsub.f32 %v126_v36, %v62_v16 }
  0x2f   :  { %v395_v6 = vadd.f32 %v394_v0, %v152_v57  ;;  %v110_v33 = vmul.f32 %v94_v29, %v94_v29 }
  0x30   :  { %640 = vmatpush3.bf16.msra.mxu0 %v637_v23  ;;  %659 = vmatpush3.bf16.msra.mxu1 %v637_v23  ;;  %v378_v8 = vadd.f32 %v377_v3, %v105_v62  ;;  %v141_v23 = vsub.f32 %v125_v18, %v61_v15  ;;  %v158_v40 = vmul.f32 %v142_v38, %v142_v38  ;;  %v324_v3 = vld [vmem:[%s1127_s3 + $0x20] sm:$0xff] }
  0x31   :  { %642 = vmatprep.subr.bf16.mxu0 %v641_v60  ;;  %652 = vmatprep.subr.bf16.mxu1 %v641_v60  ;;  %v396_v9 = vadd.f32 %v395_v6, %v153_v1  ;;  %v325_v1 = vld [vmem:[%s1127_s3 + $0x28] sm:$0xff]  ;;  %v332_v38 = vld [vmem:[%s1127_s3 + $0x60] sm:$0xff] }
  0x32   :  { %v379_v11 = vadd.f32 %v378_v8, %v106_v5  ;;  %v157_v32 = vmul.f32 %v141_v23, %v141_v23  ;;  %v328_v8 = vld [vmem:[%s1127_s3 + $0x40] sm:$0xff]  ;;  %v330_v23 = vld [vmem:[%s1127_s3 + $0x50] sm:$0xff] }
  0x33   :  { %v397_v12 = vadd.f32 %v396_v9, %v154_v7 }
  0x34   :  { %644 = vmatpush3.bf16.msra.mxu0 %v641_v60  ;;  %660 = vmatpush3.bf16.msra.mxu1 %v641_v60 }
  0x35   :  { %v398_v13 = vadd.f32 %v397_v12, %v155_v10 }
  0x37   :  { %590 = vmatmul.mubr.f32.vlgmr.msra.gmra.mrb[0].mxu0 %v863_v17  ;;  %602 = vmatmul.mubr.f32.vlgmr.msra.gmra.mrb[0].mxu1 %v56_v28  ;;  %v75_v17 = vld [vmem:[%s1124_s0 + $0x60] sm:$0xff] }
  0x38   :  { %592 = vmatprep.mubr.f32.mxu0 %v876_v24  ;;  %604 = vmatprep.mubr.f32.mxu1 %v57_v39  ;;  %v76_v24 = vld [vmem:[%s1124_s0 + $0x68] sm:$0xff] }
  0x3b   :  { %593 = vmatmul.mubr.f32.gmra.mrb[2].mxu0 %v890_v34  ;;  %605 = vmatmul.mubr.f32.gmra.mrb[2].mxu1 %v58_v50  ;;  %v91_v34 = vsub.f32 %v75_v17, %v59_v63  ;;  %v326_v17 = vld [vmem:[%s1127_s3 + $0x30] sm:$0xff] }
  0x3c   :  { %595 = vmatprep.mubr.f32.mxu0 %v900_v41  ;;  %607 = vmatprep.mubr.f32.mxu1 %v59_v63  ;;  %v92_v41 = vsub.f32 %v76_v24, %v60_v14 }
  0x3e   :  { %v108_v21 = vmul.f32 %v92_v41, %v92_v41 }
  0x3f   :  { %596 = vmatmul.mubr.f32.gmra.mrb[4].mxu0 %v916_v53  ;;  %608 = vmatmul.mubr.f32.gmra.mrb[4].mxu1 %v60_v14  ;;  %v124_v53 = vld [vmem:[%s1125_s1 + $0x68] sm:$0xff] }
  0x40   :  { %598 = vmatprep.mubr.f32.mxu0 %v926_v59  ;;  %610 = vmatprep.mubr.f32.mxu1 %v61_v15  ;;  %v77_v59 = vld [vmem:[%s1124_s0 + $0x70] sm:$0xff]  ;;  %v140_v22 = vsub.f32 %v124_v53, %v60_v14 }
  0x41   :  { %v93_v19 = vsub.f32 %v77_v59, %v61_v15  ;;  %v327_v15 = vld [vmem:[%s1127_s3 + $0x38] sm:$0xff] }
  0x42   :  { %v156_v28 = vmul.f32 %v140_v22, %v140_v22 }
  0x43   :  { %599 = vmatmul.mubr.f32.gmra.mrb[6].mxu0 %v940_v4  ;;  %611 = vmatmul.mubr.f32.gmra.mrb[6].mxu1 %v62_v16  ;;  %v107_v4 = vmul.f32 %v91_v34, %v91_v34  ;;  %v109_v30 = vmul.f32 %v93_v19, %v93_v19 }
  0x44   :  { %v399_v39 = vadd.f32 %v398_v13, %v156_v28 }
  0x45   :  { %v380_v26 = vadd.f32 %v379_v11, %v107_v4  ;;  %v329_v4 = vld [vmem:[%s1127_s3 + $0x48] sm:$0xff] }
  0x46   :  { %v400_v42 = vadd.f32 %v399_v39, %v157_v32 }
  0x47   :  { %v381_v31 = vadd.f32 %v380_v26, %v108_v21 }
  0x48   :  { %v401_v43 = vadd.f32 %v400_v42, %v158_v40 }
  0x49   :  { %v382_v35 = vadd.f32 %v381_v31, %v109_v30 }
  0x4b   :  { %v383_v37 = vadd.f32 %v382_v35, %v110_v33  ;;  %v331_v35 = vld [vmem:[%s1127_s3 + $0x58] sm:$0xff] }
  0x4d   :  { %443 = vadd.xlane.f32.xlu0 %v383_v37 }
  0x51   :  { %457 = vadd.xlane.f32.xlu0 %v401_v43 }
 0x10a   :  { %v591_v20 = vpop.f32.mrb[0].mxu0  ;;  %v603_v46 = vpop.f32.mrb[0].mxu1 }
 0x10b   :  { %v337_v47 = vsub.f32 %v321_v44, %v591_v20  ;;  %v241_v48 = vpop.f32.mrb[1].mxu0  ;;  %v281_v49 = vpop.f32.mrb[1].mxu1  ;;  %v345_v29 = vsub.f32 %v329_v4, %v603_v46 }
 0x10c   :  { %v336_v50 = vsub.f32 %v320_v45, %v241_v48  ;;  %v344_v24 = vsub.f32 %v328_v8, %v281_v49  ;;  %v333_v48 = vld [vmem:[%s1127_s3 + $0x68] sm:$0xff]  ;;  %v334_v49 = vld [vmem:[%s1127_s3 + $0x70] sm:$0xff] }
 0x10d   :  { %v353_v52 = vmul.f32 %v337_v47, %v337_v47  ;;  %v361_v42 = vmul.f32 %v345_v29, %v345_v29 }
 0x10e   :  { %v352_v55 = vmul.f32 %v336_v50, %v336_v50  ;;  %v594_v56 = vpop.f32.mrb[2].mxu0  ;;  %v606_v57 = vpop.f32.mrb[2].mxu1  ;;  %v360_v30 = vmul.f32 %v344_v24, %v344_v24 }
 0x10f   :  { %v407_v58 = vsel %vm45_vm0, %v353_v52, 0.0  ;;  %v339_v60 = vsub.f32 %v323_v51, %v594_v56  ;;  %v251_v61 = vpop.f32.mrb[3].mxu0  ;;  %v291_v62 = vpop.f32.mrb[3].mxu1  ;;  %v347_v43 = vsub.f32 %v331_v35, %v606_v57  ;;  %v423_v50 = vsel %vm45_vm0, %v361_v42, 0.0 }
 0x110   :  { %v406_v63 = vsel %vm45_vm0, %v352_v55, 0.0  ;;  %v338_v0 = vsub.f32 %v322_v54, %v251_v61  ;;  %v346_v36 = vsub.f32 %v330_v23, %v291_v62  ;;  %v421_v45 = vsel %vm45_vm0, %v360_v30, 0.0 }
 0x111   :  { %v408_v2 = vadd.f32 %v407_v58, %v406_v63  ;;  %v355_v5 = vmul.f32 %v339_v60, %v339_v60  ;;  %v363_v52 = vmul.f32 %v347_v43, %v347_v43  ;;  %v335_v60 = vld [vmem:[%s1127_s3 + $0x78] sm:$0xff] }
 0x112   :  { %v354_v6 = vmul.f32 %v338_v0, %v338_v0  ;;  %v597_v7 = vpop.f32.mrb[4].mxu0  ;;  %v609_v9 = vpop.f32.mrb[4].mxu1  ;;  %v362_v20 = vmul.f32 %v346_v36, %v346_v36 }
 0x113   :  { %v341_v10 = vsub.f32 %v325_v1, %v597_v7  ;;  %v261_v11 = vpop.f32.mrb[5].mxu0  ;;  %v301_v12 = vpop.f32.mrb[5].mxu1  ;;  %v411_v34 = vsel %vm45_vm0, %v355_v5, 0.0  ;;  %v349_v55 = vsub.f32 %v333_v48, %v609_v9  ;;  %v427_v61 = vsel %vm45_vm0, %v363_v52, 0.0 }
 0x114   :  { %v409_v13 = vsel %vm45_vm0, %v354_v6, 0.0  ;;  %v340_v14 = vsub.f32 %v324_v3, %v261_v11  ;;  %v348_v46 = vsub.f32 %v332_v38, %v301_v12  ;;  %v425_v54 = vsel %vm45_vm0, %v362_v20, 0.0  ;;  %v404_v12 = vld [vmem:[#allocation4] sm:$0xff] }
 0x115   :  { %v410_v16 = vadd.f32 %v409_v13, %v408_v2  ;;  %v357_v41 = vmul.f32 %v341_v10, %v341_v10  ;;  %v365_v63 = vmul.f32 %v349_v55, %v349_v55 }
 0x116   :  { %v356_v53 = vmul.f32 %v340_v14, %v340_v14  ;;  %v600_v59 = vpop.f32.mrb[6].mxu0  ;;  %v612_v18 = vpop.f32.mrb[6].mxu1  ;;  %v364_v56 = vmul.f32 %v348_v46, %v348_v46 }
 0x117   :  { %v412_v21 = vadd.f32 %v411_v34, %v410_v16  ;;  %v343_v22 = vsub.f32 %v327_v15, %v600_v59  ;;  %v271_v19 = vpop.f32.mrb[7].mxu0  ;;  %v311_v25 = vpop.f32.mrb[7].mxu1  ;;  %v415_v31 = vsel %vm45_vm0, %v357_v41, 0.0  ;;  %v351_v1 = vsub.f32 %v335_v60, %v612_v18 }
 0x118   :  { %v413_v26 = vsel %vm45_vm0, %v356_v53, 0.0  ;;  %v342_v27 = vsub.f32 %v326_v17, %v271_v19  ;;  %v350_v57 = vsub.f32 %v334_v49, %v311_v25  ;;  %v429_v0 = vsel %vm45_vm0, %v364_v56, 0.0  ;;  %v444_v17 = vpop.xlane.xlu0 %443 }
 0x119   :  { %v414_v28 = vadd.f32 %v413_v26, %v412_v21  ;;  %v359_v32 = vmul.f32 %v343_v22, %v343_v22  ;;  %v431_v6 = vsel %vm45_vm0, %v365_v63, 0.0  ;;  %v367_v7 = vmul.f32 %v351_v1, %v351_v1 }
 0x11a   :  { %v358_v33 = vmul.f32 %v342_v27, %v342_v27  ;;  %v366_v2 = vmul.f32 %v350_v57, %v350_v57  ;;  %v445_v24 = vrot.slane %v444_v17, 4 }
 0x11b   :  { %v416_v37 = vadd.f32 %v415_v31, %v414_v28  ;;  %v419_v44 = vsel %vm45_vm0, %v359_v32, 0.0  ;;  %v435_v11 = vsel %vm45_vm0, %v367_v7, 0.0 }
 0x11c   :  { %v417_v39 = vsel %vm45_vm0, %v358_v33, 0.0  ;;  %v433_v8 = vsel %vm45_vm0, %v366_v2, 0.0  ;;  %v446_v34 = vadd.f32 %v445_v24, %v444_v17  ;;  %v458_v41 = vpop.xlane.xlu0 %457 }
 0x11d   :  { %v418_v40 = vadd.f32 %v417_v39, %v416_v37  ;;  %v459_v59 = vrot.slane %v458_v41, 4 }
 0x11e   :  { %v447_v53 = vrot.slane %v446_v34, 2 }
 0x11f   :  { %v420_v47 = vadd.f32 %v419_v44, %v418_v40  ;;  %v460_v4 = vadd.f32 %v459_v59, %v458_v41 }
 0x120   :  { %v448_v18 = vadd.f32 %v447_v53, %v446_v34 }
 0x121   :  { %v422_v51 = vadd.f32 %v421_v45, %v420_v47  ;;  %v461_v21 = vrot.slane %v460_v4, 2 }
 0x122   :  { %v449_v22 = vrot.slane %v448_v18, 1 }
 0x123   :  { %v424_v58 = vadd.f32 %v423_v50, %v422_v51  ;;  %v462_v19 = vadd.f32 %v461_v21, %v460_v4 }
 0x124   :  { %v450_v23 = vadd.f32 %v449_v22, %v448_v18 }
 0x125   :  { %v426_v62 = vadd.f32 %v425_v54, %v424_v58  ;;  %v463_v25 = vrot.slane %v462_v19, 1 }
 0x126   :  { %661 = vpush %v450_v23 }
 0x127   :  { %v428_v3 = vadd.f32 %v427_v61, %v426_v62  ;;  %v464_v26 = vadd.f32 %v463_v25, %v462_v19 }
 0x129   :  { %v430_v5 = vadd.f32 %v429_v0, %v428_v3  ;;  %663 = vpush %v464_v26 }
 0x12b   :  { %v432_v9 = vadd.f32 %v431_v6, %v430_v5 }
 0x12d   :  { %v434_v10 = vadd.f32 %v433_v8, %v432_v9 }
 0x12f   :  { %v436_v13 = vadd.f32 %v435_v11, %v434_v10 }
 0x131   :  { %v437_v14 = vadd.f32 %v436_v13, %v404_v12 }
 0x133   :  { %438 = vst.msk [vmem:[#allocation4] sm:$0xff] %vm45_vm0, %v437_v14 }
 0x13a   :  { %v469_v15 = vld [vmem:[#allocation4] sm:$0xff] }
 0x13b   :  { %v470_v16 = vsel %vm45_vm0, %v469_v15, 0.0 }
 0x13c   :  { %471 = vadd.xlane.f32.xlu1 %v470_v16 }
 0x157   :  { %s662_s3 = spop %661 }
 0x158   :  { %v452_v27 = vstv %s662_s3 }
 0x159   :  { %455 = vst.msk [vmem:[#allocation8] sm:$0x1] %vm454_vm1, %v452_v27 }
 0x15a   :  { %s664_s17 = spop %663 }
 0x15b   :  { %v466_v28 = vstv %s664_s17 }
 0x15c   :  { %468 = vst.msk [vmem:[#allocation9] sm:$0x1] %vm454_vm1, %v466_v28 }
 0x15d   :  { %707 = shalt.err (!%p704_p12)
}
 0x15e   :  { %s708_s24 = scalar_lea.hbm %s1130_s6, 16 }
 0x15f   :  { %p709_p13 = scmp.ne.s32.totalorder %s1130_s6, %s708_s24  ;;  %p712_p0 = scmp.lt.u32.totalorder %s708_s24, %s1130_s6 }
 0x161   :  { %p714_p1 = pnand %p712_p0, %p709_p13 }
 0x163   :  { %717 = shalt.err (!%p714_p1)
}
 0x164   :  { %502 = dma.vmem_to_hbm [thread:$0]  %s500_s19, 16, %s1130_s6, [#allocation10]  }
 0x165   :  { %s718_s8 = scalar_lea.vmem %s490_s21, 16  ;;  %s722_s9 = scalar_lea.vmem %s490_s21, 32 }
 0x166   :  { %p719_p2 = scmp.ne.s32.totalorder %s490_s21, %s718_s8  ;;  %p723_p3 = scmp.lt.s32.totalorder %s490_s21, %s490_s21 }
 0x167   :  { %p724_p4 = scmp.lt.s32.totalorder %s722_s9, %s718_s8 }
 0x169   :  { %p725_p5 = por %p724_p4, %p723_p3 }
 0x16b   :  { %p726_p6 = pnand %p725_p5, %p719_p2 }
 0x16d   :  { %729 = shalt.err (!%p726_p6)
}
 0x16e   :  { %s730_s12 = scalar_lea.hbm %s1129_s5, 16 }
 0x16f   :  { %p731_p7 = scmp.ne.s32.totalorder %s1129_s5, %s730_s12  ;;  %p734_p8 = scmp.lt.u32.totalorder %s730_s12, %s1129_s5 }
 0x171   :  { %p736_p9 = pnand %p734_p8, %p731_p7 }
 0x173   :  { %739 = shalt.err (!%p736_p9)
}
 0x174   :  { %492 = dma.vmem_to_hbm [thread:$0]  %s490_s21, 16, %s1129_s5, [#allocation7]  }
 0x175   :  { %s774_s1 = smov [#allocation11]  }
 0x176   :  { %s509_s3 = sshll.u32 %s774_s1, 4  ;;  %s510_s3 = int_to_ptr.vmem [resolvable:$true] %s509_s3 }
 0x177   :  { %s740_s18 = scalar_lea.vmem %s510_s3, 16  ;;  %s744_s19 = scalar_lea.vmem %s510_s3, 32 }
 0x178   :  { %p741_p10 = scmp.ne.s32.totalorder %s510_s3, %s740_s18  ;;  %p745_p11 = scmp.lt.s32.totalorder %s510_s3, %s510_s3 }
 0x179   :  { %p746_p12 = scmp.lt.s32.totalorder %s744_s19, %s740_s18 }
 0x17b   :  { %p747_p13 = por %p746_p12, %p745_p11 }
 0x17d   :  { %p748_p0 = pnand %p747_p13, %p741_p10 }
 0x1c9   :  { %v472_v29 = vpop.xlane.xlu1 %471 }
 0x1ca   :  { %v473_v30 = vrot.slane %v472_v29, 4 }
 0x1cc   :  { %v474_v31 = vadd.f32 %v473_v30, %v472_v29 }
 0x1ce   :  { %v475_v32 = vrot.slane %v474_v31, 2 }
 0x1d0   :  { %v476_v33 = vadd.f32 %v475_v32, %v474_v31 }
 0x1d2   :  { %v477_v35 = vrot.slane %v476_v33, 1 }
 0x1d4   :  { %v478_v36 = vadd.f32 %v477_v35, %v476_v33 }
 0x1d6   :  { %665 = vpush %v478_v36 }
 0x207   :  { %s666_s17 = spop %665 }
 0x208   :  { %v480_v37 = vstv %s666_s17 }
 0x209   :  { %482 = vst.msk [vmem:[#allocation11] sm:$0x1] %vm454_vm1, %v480_v37 }
 0x20a   :  { %751 = shalt.err (!%p748_p0)
}
 0x20b   :  { %s752_s21 = scalar_lea.hbm %s1131_s7, 16 }
 0x20c   :  { %p753_p1 = scmp.ne.s32.totalorder %s1131_s7, %s752_s21  ;;  %p756_p2 = scmp.lt.u32.totalorder %s752_s21, %s1131_s7 }
 0x20e   :  { %p758_p3 = pnand %p756_p2, %p753_p1 }
 0x210   :  { %761 = shalt.err (!%p758_p3)
}
 0x211   :  { %512 = dma.vmem_to_hbm [thread:$0]  %s510_s3, 16, %s1131_s7, [#allocation10]  }
 0x212   :  { %764 = dma.done.wait [#allocation7], 16  }
 0x213   :  { %765 = vsyncadd [#allocation7], 4294967280 }
 0x214   :  { %766 = dma.done.wait [#allocation10], 32  }
 0x215   :  { %767 = vsyncadd [#allocation10], 4294967264 }
 0x216   :  { %522 = vsyncpa [#allocation6], 1 }
 0x217   :  { %523 = vsyncpa [#allocation7], 1 }
 0x218   :  { %524 = vsyncpa [#allocation10], 1 }

</bundles_post_ra>
